<compile_context>
chip_gen: v6e
topology: v6e:2x2x1
jax: 0.10.0
libtpu: 0.0.40
codegen_flags: <defaults>
</compile_context>

<pallas_src>
import jax
import jax.numpy as jnp
from jax.experimental import pallas as pl
from jax.experimental.pallas import tpu as pltpu


def mlp_kernel(x_ref, w1_ref, b1_ref, w2_ref, b2_ref, y_ref):
    # x_ref: (1, TN)   batch tile on the lane axis
    # w1_ref, b1_ref, w2_ref: (hid, 1);  b2_ref: (1, 1);  y_ref: (1, TN)
    x = x_ref[...]                                          # (1, TN)
    # layer1 + sigmoid: (hid,1)*(1,TN) + (hid,1) -> (hid, TN); VPU + EUP only.
    pre = w1_ref[...] * x + b1_ref[...]
    h = pl.reciprocal(1.0 + jnp.exp(-pre), approx=True)     # sigmoid on EUP
    # layer2: weighted reduction over the hidden (sublane) axis -> (1, TN).
    y = jnp.sum(w2_ref[...] * h, axis=0, keepdims=True) + b2_ref[...]
    y_ref[...] = y.astype(y_ref.dtype)


def net_forward(x, w1, b1, w2, b2, *, lane_tile=512):
    """Forward pass of Net.

    Args use PyTorch nn.Linear layouts:
      x : (N, 1)     input
      w1: (hid, 1)   layer1.weight (out_features, in_features), in_features == 1
      b1: (hid,)     layer1.bias
      w2: (1, hid)   layer2.weight, out_features == 1
      b2: (1,)       layer2.bias
    Returns y: (N, 1).
    """
    N = x.shape[0]
    hid = w1.shape[0]
    assert w1.shape == (hid, 1) and w2.shape == (1, hid)
    assert b1.shape == (hid,) and b2.shape == (1,)

    # Pad the batch axis to a lane-aligned multiple of the tile and put it on lanes.
    n128 = ((N + 127) // 128) * 128
    tn = min(lane_tile, n128)                 # lane tile (multiple of 128)
    n_pad = ((n128 + tn - 1) // tn) * tn      # total padded lanes, multiple of tn
    grid = (n_pad // tn,)

    x_row = jnp.zeros((1, n_pad), jnp.float32).at[0, :N].set(
        x[:, 0].astype(jnp.float32))

    w1_col = w1.reshape(hid, 1).astype(jnp.float32)
    b1_col = b1.reshape(hid, 1).astype(jnp.float32)
    w2_col = w2.reshape(1, hid).T.astype(jnp.float32)   # (1, hid) -> (hid, 1)
    b2_sc = b2.reshape(1, 1).astype(jnp.float32)

    y_row = pl.pallas_call(
        mlp_kernel,
        out_shape=jax.ShapeDtypeStruct((1, n_pad), jnp.float32),
        grid=grid,
        in_specs=[
            pl.BlockSpec((1, tn), lambda i: (0, i)),      # x tile: lane-dense
            pl.BlockSpec((hid, 1), lambda i: (0, 0)),     # w1 (full, resident)
            pl.BlockSpec((hid, 1), lambda i: (0, 0)),     # b1
            pl.BlockSpec((hid, 1), lambda i: (0, 0)),     # w2 (as column)
            pl.BlockSpec((1, 1), lambda i: (0, 0)),       # b2
        ],
        out_specs=pl.BlockSpec((1, tn), lambda i: (0, i)),
        compiler_params=pltpu.CompilerParams(
            dimension_semantics=("parallel",)),
    )(x_row, w1_col, b1_col, w2_col, b2_sc)

    return y_row[0, :N].reshape(N, 1)


def init_params(key, in_size, hidd_size, out_size):
    """Deterministic init mirroring torch.nn.Linear's U(-1/sqrt(fan_in), ...).

    Returns params in PyTorch layouts: w1 (hid, in), b1 (hid,), w2 (out, hid), b2 (out,).
    """
    k1, k2, k3, k4 = jax.random.split(key, 4)
    bound1 = 1.0 / jnp.sqrt(in_size)
    bound2 = 1.0 / jnp.sqrt(hidd_size)
    w1 = jax.random.uniform(k1, (hidd_size, in_size), jnp.float32, -bound1, bound1)
    b1 = jax.random.uniform(k2, (hidd_size,), jnp.float32, -bound1, bound1)
    w2 = jax.random.uniform(k3, (out_size, hidd_size), jnp.float32, -bound2, bound2)
    b2 = jax.random.uniform(k4, (out_size,), jnp.float32, -bound2, bound2)
    return w1, b1, w2, b2


def _reference(x, w1, b1, w2, b2):
    # Plain-JAX reference with PyTorch Linear semantics.
    h = jax.nn.sigmoid(x @ w1.T + b1)
    return h @ w2.T + b2


if __name__ == "__main__":
    in_size, hidd_size, out_size = 1, 32, 1
    key = jax.random.PRNGKey(0)
    w1, b1, w2, b2 = init_params(key, in_size, hidd_size, out_size)

    # Case 1: matches the script's usage: x = unsqueeze(linspace(-2, 2, 100), 1).
    N = 100
    x = jnp.linspace(-2.0, 2.0, N, dtype=jnp.float32).reshape(N, 1)
    y = net_forward(x, w1, b1, w2, b2)
    jax.block_until_ready(y)
    y_ref = _reference(x, w1, b1, w2, b2)
    assert y.shape == (N, out_size)
    # Tolerance comfortably covers the EUP approximate-reciprocal sigmoid.
    assert jnp.allclose(y, y_ref, atol=1e-2, rtol=1e-2), float(
        jnp.max(jnp.abs(y - y_ref)))

    # Case 2: larger batch to exercise the multi-step (parallel) grid + padding.
    N2 = 1300
    x2 = jnp.linspace(-2.0, 2.0, N2, dtype=jnp.float32).reshape(N2, 1)
    y2 = net_forward(x2, w1, b1, w2, b2)
    jax.block_until_ready(y2)
    y2_ref = _reference(x2, w1, b1, w2, b2)
    assert y2.shape == (N2, out_size)
    assert jnp.allclose(y2, y2_ref, atol=1e-2, rtol=1e-2), float(
        jnp.max(jnp.abs(y2 - y2_ref)))

    print("KERNEL_OK")
</pallas_src>

<mosaic_0001>
module attributes {stable_mosaic.version = 11 : i64} {
  func.func @mlp_kernel(%arg0: i32, %arg1: memref<1x128xf32, #tpu.memory_space<vmem>>, %arg2: memref<32x1xf32, #tpu.memory_space<vmem>>, %arg3: memref<32x1xf32, #tpu.memory_space<vmem>>, %arg4: memref<32x1xf32, #tpu.memory_space<vmem>>, %arg5: memref<1x1xf32, #tpu.memory_space<vmem>>, %arg6: memref<1x128xf32, #tpu.memory_space<vmem>>) attributes {dimension_semantics = [#tpu.dimension_semantics<parallel>], iteration_bounds = array<i64: 1>, scalar_prefetch = 0 : i64, scratch_operands = 0 : i64, tpu.core_type = #tpu.core_type<tc>, window_params = [{transform_indices = @transform_0, window_bounds = array<i64: 1, 128>}, {pipeline_mode = #tpu.pipeline_mode<synchronous>, transform_indices = @transform_1, window_bounds = array<i64: 32, 1>}, {pipeline_mode = #tpu.pipeline_mode<synchronous>, transform_indices = @transform_2, window_bounds = array<i64: 32, 1>}, {pipeline_mode = #tpu.pipeline_mode<synchronous>, transform_indices = @transform_3, window_bounds = array<i64: 32, 1>}, {pipeline_mode = #tpu.pipeline_mode<synchronous>, transform_indices = @transform_4, window_bounds = array<i64: 1, 1>}, {transform_indices = @transform_5, window_bounds = array<i64: 1, 128>}]} {
    %c0 = arith.constant 0 : index
    %c0_0 = arith.constant 0 : index
    %0 = vector.load %arg1[%c0, %c0_0] : memref<1x128xf32, #tpu.memory_space<vmem>>, vector<1x128xf32>
    %c0_1 = arith.constant 0 : index
    %c0_2 = arith.constant 0 : index
    %1 = vector.load %arg2[%c0_1, %c0_2] : memref<32x1xf32, #tpu.memory_space<vmem>>, vector<32x1xf32>
    %2 = vector.broadcast %1 : vector<32x1xf32> to vector<32x128xf32>
    %3 = vector.broadcast %0 : vector<1x128xf32> to vector<32x128xf32>
    %4 = arith.mulf %2, %3 : vector<32x128xf32>
    %c0_3 = arith.constant 0 : index
    %c0_4 = arith.constant 0 : index
    %5 = vector.load %arg3[%c0_3, %c0_4] : memref<32x1xf32, #tpu.memory_space<vmem>>, vector<32x1xf32>
    %6 = vector.broadcast %5 : vector<32x1xf32> to vector<32x128xf32>
    %7 = arith.addf %4, %6 : vector<32x128xf32>
    %cst = arith.constant 0.000000e+00 : f32
    %8 = vector.broadcast %cst : f32 to vector<32x128xf32>
    %9 = arith.subf %8, %7 : vector<32x128xf32>
    %10 = math.exp %9 : vector<32x128xf32>
    %cst_5 = arith.constant 1.000000e+00 : f32
    %11 = vector.broadcast %cst_5 : f32 to vector<32x128xf32>
    %12 = arith.addf %11, %10 : vector<32x128xf32>
    %13 = tpu.reciprocal %12 {approx = true} : vector<32x128xf32> -> vector<32x128xf32>
    %c0_6 = arith.constant 0 : index
    %c0_7 = arith.constant 0 : index
    %14 = vector.load %arg4[%c0_6, %c0_7] : memref<32x1xf32, #tpu.memory_space<vmem>>, vector<32x1xf32>
    %15 = vector.broadcast %14 : vector<32x1xf32> to vector<32x128xf32>
    %16 = arith.mulf %15, %13 : vector<32x128xf32>
    %cst_8 = arith.constant dense<0.000000e+00> : vector<128xf32>
    %17 = vector.multi_reduction <add>, %16, %cst_8 [0] : vector<32x128xf32> to vector<128xf32>
    %18 = vector.shape_cast %17 : vector<128xf32> to vector<1x128xf32>
    %c0_9 = arith.constant 0 : index
    %c0_10 = arith.constant 0 : index
    %19 = vector.load %arg5[%c0_9, %c0_10] : memref<1x1xf32, #tpu.memory_space<vmem>>, vector<1x1xf32>
    %20 = vector.broadcast %19 : vector<1x1xf32> to vector<1x128xf32>
    %21 = arith.addf %18, %20 : vector<1x128xf32>
    %c0_11 = arith.constant 0 : index
    %c0_12 = arith.constant 0 : index
    %22 = vector.load %arg6[%c0_11, %c0_12] : memref<1x128xf32, #tpu.memory_space<vmem>>, vector<1x128xf32>
    tpu.vector_store %arg6[%c0_11, %c0_12], %21 {strides = array<i32>} : memref<1x128xf32, #tpu.memory_space<vmem>>, vector<1x128xf32>,
    return
  }
  func.func @transform_0(%arg0: i32) -> (i32, i32) {
    %c0_i32 = arith.constant 0 : i32
    %c0_i32_0 = arith.constant 0 : i32
    return %c0_i32, %arg0 : i32, i32
  }
  func.func @transform_1(%arg0: i32) -> (i32, i32) {
    %c0_i32 = arith.constant 0 : i32
    %c0_i32_0 = arith.constant 0 : i32
    %c0_i32_1 = arith.constant 0 : i32
    return %c0_i32, %c0_i32_0 : i32, i32
  }
  func.func @transform_2(%arg0: i32) -> (i32, i32) {
    %c0_i32 = arith.constant 0 : i32
    %c0_i32_0 = arith.constant 0 : i32
    %c0_i32_1 = arith.constant 0 : i32
    return %c0_i32, %c0_i32_0 : i32, i32
  }
  func.func @transform_3(%arg0: i32) -> (i32, i32) {
    %c0_i32 = arith.constant 0 : i32
    %c0_i32_0 = arith.constant 0 : i32
    %c0_i32_1 = arith.constant 0 : i32
    return %c0_i32, %c0_i32_0 : i32, i32
  }
  func.func @transform_4(%arg0: i32) -> (i32, i32) {
    %c0_i32 = arith.constant 0 : i32
    %c0_i32_0 = arith.constant 0 : i32
    %c0_i32_1 = arith.constant 0 : i32
    return %c0_i32, %c0_i32_0 : i32, i32
  }
  func.func @transform_5(%arg0: i32) -> (i32, i32) {
    %c0_i32 = arith.constant 0 : i32
    %c0_i32_0 = arith.constant 0 : i32
    return %c0_i32, %arg0 : i32, i32
  }
}

</mosaic_0001>

<bundles_post_ra>
// kernel: tpu_custom_call.1
= control target key start
LH: loop header
LB: loop body
LE: loop exit
PB: predicated region body
PF: predicated region fallthrough
CT: control target
= control target key end

     0   :  { %s289_s0 = inlined_call_operand.vmem [shape: f32[1,128], index: 0, kind: input, shape index: {}]   ;;  %s290_s1 = inlined_call_operand.vmem [shape: f32[32,1], index: 1, kind: input, shape index: {}]   ;;  %s291_s2 = inlined_call_operand.vmem [shape: f32[32,1], index: 2, kind: input, shape index: {}]   ;;  %s292_s3 = inlined_call_operand.vmem [shape: f32[32,1], index: 3, kind: input, shape index: {}]   ;;  %s293_s4 = inlined_call_operand.<no memory space> [shape: f32[1,1], index: 4, kind: input, shape index: {}]   ;;  %s294_s5 = inlined_call_operand.hbm [shape: f32[1,128], index: 5, kind: output, shape index: {}]  }
   0x1   :  { %v10_v0 = vstv %s293_s4 }
   0x2   :  { %11 = vst [vmem:[#allocation2] sm:$0x1] %v10_v0 }
   0x3   :  { %v26_v1 = vld [vmem:[%s290_s1 + $0x10] sm:$0xff]  ;;  %v24_v2 = vld [vmem:[%s290_s1] sm:$0xff]  ;;  %v212_v3 = vmov 0   ;;  %v25_v5 = vld [vmem:[%s290_s1 + $0x8] sm:$0xff] }
   0x4   :  { %173 = vset.pattern.permute.xlu1 %v212_v3  ;;  %172 = vset.pattern.permute.xlu0 %v212_v3  ;;  %v58_v4 = vld [vmem:[%s291_s2] sm:$0xff] }
   0x5   :  { %40 = vperm.xlu1 %173, %v26_v1   ;;  %30 = vperm.xlu0 %172, %v24_v2  }
   0x6   :  { %12 = vsyncpa [#allocation4], 0  ;;  %v27_v6 = vld [vmem:[%s290_s1 + $0x18] sm:$0xff]  ;;  %v59_v7 = vld [vmem:[%s291_s2 + $0x8] sm:$0xff]  ;;  %v149_v63 = vlaneseq }
   0x7   :  { %v61_v8 = vld [vmem:[%s291_s2 + $0x18] sm:$0xff]  ;;  %v60_v9 = vld [vmem:[%s291_s2 + $0x10] sm:$0xff]  ;;  %v107_v10 = vld [vmem:[%s292_s3 + $0x8] sm:$0xff] }
   0x8   :  { %v106_v11 = vld [vmem:[%s292_s3] sm:$0xff]  ;;  %v109_v12 = vld [vmem:[%s292_s3 + $0x18] sm:$0xff]  ;;  %v108_v13 = vld [vmem:[%s292_s3 + $0x10] sm:$0xff]  ;;  %v150_v2 = vshrl.u32 %v149_v63, 7 }
   0x9   :  { %64 = vperm.xlu1 %173, %v58_v4   ;;  %35 = vperm.xlu0 %172, %v25_v5   ;;  %v143_v14 = vld [vmem:[#allocation2] sm:$0x1] }
   0xa   :  { %v169_v16 = vld [vmem:[%s289_s0] ss:$0 sm:$0xff]  ;;  %v151_v4 = vsub.s32 0, %v150_v2  ;;  %s213_s0 = smov [#allocation3]  }
   0xb   :  { %s161_s3 = sshll.u32 %s213_s0, 4  ;;  %s162_s3 = int_to_ptr.vmem [resolvable:$true] %s161_s3 }
   0xc   :  { %s190_s18 = scalar_lea.vmem %s162_s3, 16  ;;  %s194_s19 = scalar_lea.vmem %s162_s3, 32 }
   0xd   :  { %45 = vperm.xlu1 %173, %v27_v6   ;;  %69 = vperm.xlu0 %172, %v59_v7   ;;  %p191_p0 = scmp.ne.s32.totalorder %s162_s3, %s190_s18  ;;  %p195_p1 = scmp.lt.s32.totalorder %s162_s3, %s162_s3 }
   0xe   :  { %p196_p2 = scmp.lt.s32.totalorder %s194_s19, %s190_s18 }
  0x10   :  { %p197_p3 = por %p196_p2, %p195_p1 }
  0x11   :  { %79 = vperm.xlu1 %173, %v61_v8   ;;  %74 = vperm.xlu0 %172, %v60_v9  }
  0x12   :  { %p198_p4 = pnand %p197_p3, %p191_p0 }
  0x15   :  { %117 = vperm.xlu1 %173, %v107_v10   ;;  %112 = vperm.xlu0 %172, %v106_v11  }
  0x19   :  { %127 = vperm.xlu1 %173, %v109_v12   ;;  %122 = vperm.xlu0 %172, %v108_v13  }
  0x1d   :  { %146 = vperm.xlu0 %172, %v143_v14  }
  0x80   :  { %v41_v15 = vpop.permute.xlu1 %40  ;;  %v31_v17 = vpop.permute.xlu0 %30 }
  0x81   :  { %v54_v18 = vmul.f32 %v169_v16, %v31_v17  ;;  %v56_v28 = vmul.f32 %v169_v16, %v41_v15 }
  0x84   :  { %v65_v19 = vpop.permute.xlu1 %64  ;;  %v36_v20 = vpop.permute.xlu0 %35 }
  0x85   :  { %v82_v21 = vadd.f32 %v65_v19, %v54_v18  ;;  %v55_v23 = vmul.f32 %v169_v16, %v36_v20 }
  0x87   :  { %v86_v22 = vsub.f32 0.0, %v82_v21 }
  0x88   :  { %v46_v24 = vpop.permute.xlu1 %45  ;;  %v70_v25 = vpop.permute.xlu0 %69 }
  0x89   :  { %v90_v26 = vmul.f32 1.442695, %v86_v22  ;;  %v83_v27 = vadd.f32 %v70_v25, %v55_v23  ;;  %v57_v29 = vmul.f32 %v169_v16, %v46_v24 }
  0x8b   :  { %v87_v30 = vsub.f32 0.0, %v83_v27  ;;  %174 = vpow2.f32 %v90_v26 }
  0x8c   :  { %v80_v31 = vpop.permute.xlu1 %79  ;;  %v75_v32 = vpop.permute.xlu0 %74 }
  0x8d   :  { %v92_v33 = vmul.f32 1.442695, %v87_v30  ;;  %v85_v34 = vadd.f32 %v80_v31, %v57_v29  ;;  %v84_v35 = vadd.f32 %v75_v32, %v56_v28 }
  0x8f   :  { %176 = vpow2.f32 %v92_v33  ;;  %v89_v36 = vsub.f32 0.0, %v85_v34  ;;  %v88_v37 = vsub.f32 0.0, %v84_v35 }
  0x90   :  { %v113_v48 = vpop.permute.xlu0 %112  ;;  %v118_v51 = vpop.permute.xlu1 %117 }
  0x91   :  { %v96_v38 = vmul.f32 1.442695, %v89_v36  ;;  %v94_v39 = vmul.f32 1.442695, %v88_v37 }
  0x93   :  { %178 = vpow2.f32 %v96_v38 }
  0x94   :  { %180 = vpow2.f32 %v94_v39  ;;  %v123_v56 = vpop.permute.xlu0 %122  ;;  %v128_v59 = vpop.permute.xlu1 %127 }
  0x98   :  { %v175_v40 = vpop.eup %174  ;;  %v147_v6 = vpop.permute.xlu0 %146 }
  0x99   :  { %v98_v42 = vadd.f32 1.0, %v175_v40  ;;  %v152_v8 = vrot.slane %v147_v6, %v151_v4 }
  0x9c   :  { %v177_v41 = vpop.eup %176 }
  0x9d   :  { %v99_v43 = vadd.f32 1.0, %v177_v41 }
  0x9f   :  { %182 = vrcp.f32 %v99_v43 }
  0xa0   :  { %v179_v44 = vpop.eup %178  ;;  %184 = vrcp.f32 %v98_v42 }
  0xa1   :  { %v181_v45 = vpop.eup %180  ;;  %v101_v46 = vadd.f32 1.0, %v179_v44 }
  0xa2   :  { %v100_v47 = vadd.f32 1.0, %v181_v45 }
  0xa3   :  { %186 = vrcp.f32 %v101_v46 }
  0xa4   :  { %188 = vrcp.f32 %v100_v47 }
  0xac   :  { %v183_v49 = vpop.eup %182 }
  0xad   :  { %v185_v50 = vpop.eup %184  ;;  %v131_v52 = vmul.f32 %v183_v49, %v118_v51 }
  0xae   :  { %v130_v54 = vmul.f32 %v185_v50, %v113_v48 }
  0xb0   :  { %v187_v53 = vpop.eup %186  ;;  %v134_v57 = vadd.f32 %v131_v52, %v130_v54 }
  0xb1   :  { %v189_v55 = vpop.eup %188  ;;  %v133_v60 = vmul.f32 %v187_v53, %v128_v59 }
  0xb2   :  { %v132_v58 = vmul.f32 %v189_v55, %v123_v56 }
  0xb4   :  { %v135_v61 = vadd.f32 %v134_v57, %v132_v58 }
  0xb6   :  { %v136_v62 = vadd.f32 %v135_v61, %v133_v60 }
  0xb8   :  { %v137_v0 = vrot.slane %v136_v62, 4 }
  0xba   :  { %v138_v1 = vadd.f32 %v137_v0, %v136_v62 }
  0xbc   :  { %v139_v3 = vrot.slane %v138_v1, 2 }
  0xbe   :  { %v140_v5 = vadd.f32 %v139_v3, %v138_v1 }
  0xc0   :  { %v141_v7 = vrot.slane %v140_v5, 1 }
  0xc2   :  { %v142_v9 = vadd.f32 %v141_v7, %v140_v5 }
  0xc4   :  { %v153_v10 = vadd.f32 %v152_v8, %v142_v9 }
  0xc6   :  { %154 = vst [vmem:[#allocation3] sm:$0x1] %v153_v10 }
  0xc7   :  { %201 = shalt.err (!%p198_p4)
}
  0xc8   :  { %164 = dma.vmem_to_hbm [thread:$0]  %s162_s3, 16, %s294_s5, [#allocation4]  }
  0xc9   :  { %210 = dma.done.wait [#allocation4], 16  }
  0xca   :  { %211 = vsyncadd [#allocation4], 4294967280 }
  0xcb   :  { %168 = vsyncpa [#allocation4], 1 }

</bundles_post_ra>
